<compile_context>
chip_gen: v7x
topology: tpu7x:2x2x1
jax: 0.10.0
libtpu: 0.0.40
codegen_flags: <defaults>
</compile_context>

<pallas_src>
import jax
import jax.numpy as jnp
from jax import lax
from jax.experimental import pallas as pl
from jax.experimental.pallas import tpu as pltpu

EMB_SIZE = 30
HIDDEN = 256
DEFAULT_TM = 1024      # batch rows per grid step


def _round_up(x, m):
    return (x + m - 1) // m * m


def _net_kernel(x_ref, st_ref, w1x_ref, t_ref, w2_ref, b2_ref, o_ref):
    # x_ref  : (TM, K_pad)            dense features (K padded only to 8)
    # st_ref : (TM, 2) int32          station indices
    # w1x_ref: (K_pad, 256)           fc1 rows for dense features
    # t_ref  : (2*NS_pad, 256)        [emb@W1[e0]+b1 ; emb@W1[e1]] stacked
    # w2_ref : (1, 256)               fc2 weight as a row vector
    # b2_ref : (1, 1) f32 in SMEM     fc2 bias scalar
    # o_ref  : (TM, 1)                output logits
    x = x_ref[...]
    st = st_ref[...]
    tm = x.shape[0]
    ns2 = t_ref.shape[0]
    ns_pad = ns2 // 2

    # Fused embedding gather + concat: a single one-hot over both stations,
    # matched against the stacked table T = [T0; T1] (exact MXU matmul).
    iota = lax.broadcasted_iota(jnp.int32, (tm, ns2), 1)
    tgt = jnp.where(iota < ns_pad, st[:, 0:1], st[:, 1:2] + ns_pad)
    oh = (iota == tgt).astype(x.dtype)

    h = jnp.dot(x, w1x_ref[...], preferred_element_type=jnp.float32)
    h += jnp.dot(oh, t_ref[...], preferred_element_type=jnp.float32)  # b1 folded in
    h = jnp.maximum(h, 0.0)  # ReLU

    # fc2: 1-wide output -> VPU multiply + lane reduction (no padded MXU pass).
    out = jnp.sum(h * w2_ref[...].astype(jnp.float32), axis=-1, keepdims=True)
    out += b2_ref[0, 0]
    o_ref[...] = out.astype(o_ref.dtype)


def net_forward(x, stations, params, *, tile_m=DEFAULT_TM,
                compute_dtype=jnp.float32):
    """x: (B, NUM_STATES) f32, stations: (B, 2) int.  Returns (B, 1) f32."""
    emb_table = params["emb"].astype(jnp.float32)      # (NS, 30)
    w1, b1 = params["w1"], params["b1"]                # (NS+60, 256), (256,)
    w2, b2 = params["w2"], params["b2"]                # (256, 1), (1,)

    B, ns = x.shape
    assert w1.shape[0] == ns + 2 * EMB_SIZE

    # Fold the embedding lookup + concat into gather tables (tiny matmuls).
    hp = lax.Precision.HIGHEST
    w1x = w1[:ns]
    t0 = jnp.dot(emb_table, w1[ns:ns + EMB_SIZE], precision=hp) + b1[None, :]
    t1 = jnp.dot(emb_table, w1[ns + EMB_SIZE:ns + 2 * EMB_SIZE], precision=hp)

    # Minimal padding: sublane multiples only (no 128-lane padding of K).
    k_pad = _round_up(max(ns, 1), 8)
    ns_pad = _round_up(max(ns, 1), 8)

    # Batch tiling: big tiles to amortize per-step overhead, but keep >= 2
    # grid steps when possible so v7x's two TensorCores both get work.
    b8 = _round_up(B, 8)
    tm = min(_round_up(tile_m, 8), b8)
    if b8 // tm < 2 and b8 >= 16:
        tm = _round_up(pl.cdiv(B, 2), 8)
    b_pad = _round_up(B, tm)

    x_p = jnp.zeros((b_pad, k_pad), compute_dtype).at[:B, :ns].set(
        x.astype(compute_dtype))
    st_p = jnp.zeros((b_pad, 2), jnp.int32).at[:B].set(stations.astype(jnp.int32))
    w1x_p = jnp.zeros((k_pad, HIDDEN), compute_dtype).at[:ns].set(
        w1x.astype(compute_dtype))
    t_p = (jnp.zeros((2 * ns_pad, HIDDEN), compute_dtype)
           .at[:ns].set(t0.astype(compute_dtype))
           .at[ns_pad:ns_pad + ns].set(t1.astype(compute_dtype)))
    w2_row = w2[:, 0].reshape(1, HIDDEN).astype(compute_dtype)
    b2_2d = b2.reshape(1, 1).astype(jnp.float32)

    out_p = pl.pallas_call(
        _net_kernel,
        out_shape=jax.ShapeDtypeStruct((b_pad, 1), jnp.float32),
        grid=(b_pad // tm,),
        in_specs=[
            pl.BlockSpec((tm, k_pad), lambda i: (i, 0)),          # x rows: tiled
            pl.BlockSpec((tm, 2), lambda i: (i, 0)),               # stations: tiled
            pl.BlockSpec((k_pad, HIDDEN), lambda i: (0, 0)),       # weights resident
            pl.BlockSpec((2 * ns_pad, HIDDEN), lambda i: (0, 0)),  # stacked T resident
            pl.BlockSpec((1, HIDDEN), lambda i: (0, 0)),           # fc2 row resident
            pl.BlockSpec(memory_space=pltpu.MemorySpace.SMEM),     # b2 scalar
        ],
        out_specs=pl.BlockSpec((tm, 1), lambda i: (i, 0)),
        compiler_params=pltpu.CompilerParams(
            dimension_semantics=("parallel",),                     # megacore on v7x
        ),
    )(x_p, st_p, w1x_p, t_p, w2_row, b2_2d)

    return out_p[:B, :1]


def init_params(key, num_states):
    d_in = num_states + EMB_SIZE * 2
    k1, k2, k3, k4, k5 = jax.random.split(key, 5)
    # PyTorch: weights normal_(0, 0.1); biases default Linear init (uniform),
    # embedding default N(0, 1).  Deterministic synthetic init here.
    w1 = jax.random.normal(k1, (d_in, HIDDEN), jnp.float32) * 0.1
    b1 = jax.random.uniform(k2, (HIDDEN,), jnp.float32,
                            minval=-1.0 / jnp.sqrt(d_in), maxval=1.0 / jnp.sqrt(d_in))
    w2 = jax.random.normal(k3, (HIDDEN, 1), jnp.float32) * 0.1
    b2 = jax.random.uniform(k4, (1,), jnp.float32,
                            minval=-1.0 / jnp.sqrt(HIDDEN), maxval=1.0 / jnp.sqrt(HIDDEN))
    emb = jax.random.normal(k5, (num_states, EMB_SIZE), jnp.float32)
    return {"w1": w1, "b1": b1, "w2": w2, "b2": b2, "emb": emb}


def _reference(x, stations, params):
    emb = jnp.take(params["emb"], stations, axis=0).reshape(x.shape[0], -1)
    xc = jnp.concatenate([x, emb], axis=1)
    h = jnp.maximum(xc @ params["w1"] + params["b1"], 0.0)
    return h @ params["w2"] + params["b2"]


if __name__ == "__main__":
    NUM_STATES = 16
    BATCH = 2

    key = jax.random.PRNGKey(0)
    kp, kx, ks = jax.random.split(key, 3)
    params = init_params(kp, NUM_STATES)

    x = jax.random.normal(kx, (BATCH, NUM_STATES), jnp.float32)
    stations = jax.random.randint(ks, (BATCH, 2), 0, NUM_STATES, dtype=jnp.int32)

    out = net_forward(x, stations, params)
    jax.block_until_ready(out)
    ref = _reference(x, stations, params)
    assert out.shape == (BATCH, 1)
    assert jnp.allclose(out, ref, atol=1e-3, rtol=1e-3), (out, ref)

    # Multi-tile / padded-batch path (grid > 1, row padding, >=2 TC shards).
    B2 = 300
    kx2, ks2 = jax.random.split(jax.random.PRNGKey(1))
    x2 = jax.random.normal(kx2, (B2, NUM_STATES), jnp.float32)
    st2 = jax.random.randint(ks2, (B2, 2), 0, NUM_STATES, dtype=jnp.int32)
    out2 = net_forward(x2, st2, params, tile_m=128)
    jax.block_until_ready(out2)
    ref2 = _reference(x2, st2, params)
    assert out2.shape == (B2, 1)
    assert jnp.allclose(out2, ref2, atol=1e-3, rtol=1e-3), \
        float(jnp.max(jnp.abs(out2 - ref2)))

    # bf16 operand path (f32 accumulation) — looser tolerance for rounding.
    out3 = net_forward(x2, st2, params, tile_m=1024, compute_dtype=jnp.bfloat16)
    jax.block_until_ready(out3)
    assert out3.shape == (B2, 1)
    assert jnp.allclose(out3, ref2, atol=5e-2, rtol=5e-2), \
        float(jnp.max(jnp.abs(out3 - ref2)))

    print("KERNEL_OK")
</pallas_src>

<mosaic_0001>
module attributes {stable_mosaic.version = 11 : i64} {
  func.func @_net_kernel(%arg0: i32, %arg1: memref<8x16xf32, #tpu.memory_space<vmem>>, %arg2: memref<8x2xi32, #tpu.memory_space<vmem>>, %arg3: memref<16x256xf32, #tpu.memory_space<vmem>>, %arg4: memref<32x256xf32, #tpu.memory_space<vmem>>, %arg5: memref<1x256xf32, #tpu.memory_space<vmem>>, %arg6: memref<1x1xf32, #tpu.memory_space<smem>>, %arg7: memref<8x1xf32, #tpu.memory_space<vmem>>) attributes {dimension_semantics = [#tpu.dimension_semantics<parallel>], iteration_bounds = array<i64: 1>, scalar_prefetch = 0 : i64, scratch_operands = 0 : i64, tpu.core_type = #tpu.core_type<tc>, window_params = [{transform_indices = @transform_0, window_bounds = array<i64: 8, 16>}, {transform_indices = @transform_1, window_bounds = array<i64: 8, 2>}, {pipeline_mode = #tpu.pipeline_mode<synchronous>, transform_indices = @transform_2, window_bounds = array<i64: 16, 256>}, {pipeline_mode = #tpu.pipeline_mode<synchronous>, transform_indices = @transform_3, window_bounds = array<i64: 32, 256>}, {pipeline_mode = #tpu.pipeline_mode<synchronous>, transform_indices = @transform_4, window_bounds = array<i64: 1, 256>}, {transform_indices = @transform_5, window_bounds = array<i64: 1, 1>}, {transform_indices = @transform_6, window_bounds = array<i64: 8, 1>}]} {
    %c0 = arith.constant 0 : index
    %c0_0 = arith.constant 0 : index
    %0 = vector.load %arg1[%c0, %c0_0] : memref<8x16xf32, #tpu.memory_space<vmem>>, vector<8x16xf32>
    %c0_1 = arith.constant 0 : index
    %c0_2 = arith.constant 0 : index
    %1 = vector.load %arg2[%c0_1, %c0_2] : memref<8x2xi32, #tpu.memory_space<vmem>>, vector<8x2xi32>
    %2 = tpu.iota {dimensions = array<i32: 1>} : vector<8x32xi32>
    %c16_i32 = arith.constant 16 : i32
    %3 = vector.broadcast %c16_i32 : i32 to vector<8x32xi32>
    %4 = arith.cmpi slt, %2, %3 : vector<8x32xi32>
    %5 = vector.extract_strided_slice %1 {offsets = [0, 0], sizes = [8, 1], strides = [1, 1]} : vector<8x2xi32> to vector<8x1xi32>
    %6 = vector.extract_strided_slice %1 {offsets = [0, 1], sizes = [8, 1], strides = [1, 1]} : vector<8x2xi32> to vector<8x1xi32>
    %c16_i32_3 = arith.constant 16 : i32
    %7 = vector.broadcast %c16_i32_3 : i32 to vector<8x1xi32>
    %8 = arith.addi %6, %7 : vector<8x1xi32>
    %9 = vector.shape_cast %5 : vector<8x1xi32> to vector<8x1xi32>
    %10 = vector.broadcast %9 : vector<8x1xi32> to vector<8x32xi32>
    %11 = vector.shape_cast %8 : vector<8x1xi32> to vector<8x1xi32>
    %12 = vector.broadcast %11 : vector<8x1xi32> to vector<8x32xi32>
    %13 = arith.select %4, %10, %12 : vector<8x32xi1>, vector<8x32xi32>
    %14 = arith.cmpi eq, %2, %13 : vector<8x32xi32>
    %15 = arith.extui %14 : vector<8x32xi1> to vector<8x32xi32>
    %16 = arith.sitofp %15 : vector<8x32xi32> to vector<8x32xf32>
    %c0_4 = arith.constant 0 : index
    %c0_5 = arith.constant 0 : index
    %17 = vector.load %arg3[%c0_4, %c0_5] : memref<16x256xf32, #tpu.memory_space<vmem>>, vector<16x256xf32>
    %cst = arith.constant dense<0.000000e+00> : vector<8x256xf32>
    %18 = tpu.matmul %0, %17, %cst {dimension_numbers = #tpu.dot_dimension_numbers<[1], [0], [0], [1], [0, 0, 1, 1], [], []>} : vector<8x16xf32>, vector<16x256xf32>, vector<8x256xf32> -> vector<8x256xf32>
    %c0_6 = arith.constant 0 : index
    %c0_7 = arith.constant 0 : index
    %19 = vector.load %arg4[%c0_6, %c0_7] : memref<32x256xf32, #tpu.memory_space<vmem>>, vector<32x256xf32>
    %cst_8 = arith.constant dense<0.000000e+00> : vector<8x256xf32>
    %20 = tpu.matmul %16, %19, %cst_8 {dimension_numbers = #tpu.dot_dimension_numbers<[1], [0], [0], [1], [0, 0, 1, 1], [], []>} : vector<8x32xf32>, vector<32x256xf32>, vector<8x256xf32> -> vector<8x256xf32>
    %21 = arith.addf %18, %20 : vector<8x256xf32>
    %cst_9 = arith.constant 0.000000e+00 : f32
    %22 = vector.broadcast %cst_9 : f32 to vector<8x256xf32>
    %23 = arith.maximumf %21, %22 : vector<8x256xf32>
    %c0_10 = arith.constant 0 : index
    %c0_11 = arith.constant 0 : index
    %24 = vector.load %arg5[%c0_10, %c0_11] : memref<1x256xf32, #tpu.memory_space<vmem>>, vector<1x256xf32>
    %25 = vector.broadcast %24 : vector<1x256xf32> to vector<8x256xf32>
    %26 = arith.mulf %23, %25 : vector<8x256xf32>
    %cst_12 = arith.constant dense<0.000000e+00> : vector<8xf32>
    %27 = vector.multi_reduction <add>, %26, %cst_12 [1] : vector<8x256xf32> to vector<8xf32>
    %28 = vector.shape_cast %27 : vector<8xf32> to vector<8x1xf32>
    %c0_13 = arith.constant 0 : index
    %c0_14 = arith.constant 0 : index
    %29 = memref.load %arg6[%c0_13, %c0_14] : memref<1x1xf32, #tpu.memory_space<smem>>
    %30 = vector.broadcast %29 : f32 to vector<8x1xf32>
    %31 = arith.addf %28, %30 : vector<8x1xf32>
    %c0_15 = arith.constant 0 : index
    %c0_16 = arith.constant 0 : index
    %32 = vector.load %arg7[%c0_15, %c0_16] : memref<8x1xf32, #tpu.memory_space<vmem>>, vector<8x1xf32>
    tpu.vector_store %arg7[%c0_15, %c0_16], %31 {strides = array<i32>} : memref<8x1xf32, #tpu.memory_space<vmem>>, vector<8x1xf32>,
    return
  }
  func.func @transform_0(%arg0: i32) -> (i32, i32) {
    %c0_i32 = arith.constant 0 : i32
    %c0_i32_0 = arith.constant 0 : i32
    return %arg0, %c0_i32 : i32, i32
  }
  func.func @transform_1(%arg0: i32) -> (i32, i32) {
    %c0_i32 = arith.constant 0 : i32
    %c0_i32_0 = arith.constant 0 : i32
    return %arg0, %c0_i32 : i32, i32
  }
  func.func @transform_2(%arg0: i32) -> (i32, i32) {
    %c0_i32 = arith.constant 0 : i32
    %c0_i32_0 = arith.constant 0 : i32
    %c0_i32_1 = arith.constant 0 : i32
    return %c0_i32, %c0_i32_0 : i32, i32
  }
  func.func @transform_3(%arg0: i32) -> (i32, i32) {
    %c0_i32 = arith.constant 0 : i32
    %c0_i32_0 = arith.constant 0 : i32
    %c0_i32_1 = arith.constant 0 : i32
    return %c0_i32, %c0_i32_0 : i32, i32
  }
  func.func @transform_4(%arg0: i32) -> (i32, i32) {
    %c0_i32 = arith.constant 0 : i32
    %c0_i32_0 = arith.constant 0 : i32
    %c0_i32_1 = arith.constant 0 : i32
    return %c0_i32, %c0_i32_0 : i32, i32
  }
  func.func @transform_5(%arg0: i32) -> (i32, i32) {
    %c0_i32 = arith.constant 0 : i32
    %c0_i32_0 = arith.constant 0 : i32
    %c0_i32_1 = arith.constant 0 : i32
    return %c0_i32, %c0_i32_0 : i32, i32
  }
  func.func @transform_6(%arg0: i32) -> (i32, i32) {
    %c0_i32 = arith.constant 0 : i32
    %c0_i32_0 = arith.constant 0 : i32
    return %arg0, %c0_i32 : i32, i32
  }
}

</mosaic_0001>

<bundles_post_ra>
// kernel: tpu_custom_call.1
= control target key start
LH: loop header
LB: loop body
LE: loop exit
PB: predicated region body
PF: predicated region fallthrough
CT: control target
= control target key end

     0   :  { %12 = vsyncpa [#allocation4], 0  ;;  %s415_s0 = inlined_call_operand.vmem [shape: f32[8,16], index: 0, kind: input, shape index: {}]   ;;  %s416_s1 = inlined_call_operand.vmem [shape: s32[8,2], index: 1, kind: input, shape index: {}]   ;;  %s417_s2 = inlined_call_operand.hbm [shape: f32[16,256], index: 2, kind: input, shape index: {}]   ;;  %s418_s3 = inlined_call_operand.hbm [shape: f32[32,256], index: 3, kind: input, shape index: {}]   ;;  %s419_s4 = inlined_call_operand.vmem [shape: f32[1,256], index: 4, kind: input, shape index: {}]   ;;  %s420_s5 = inlined_call_operand.<no memory space> [shape: f32[1,1], index: 5, kind: input, shape index: {}]   ;;  %s421_s6 = inlined_call_operand.vmem [shape: f32[8,1], index: 6, kind: output, shape index: {}]  }
   0x1   :  { %13 = vsyncpa [#allocation6], 0  ;;  %s334_s21 = smov [#allocation3]   ;;  %s286_s25 = scalar_lea.hbm %s417_s2, 512 }
   0x2   :  { %s23_s22 = sshll.u32 %s334_s21, 4  ;;  %p287_p0 = scmp.ne.s32.totalorder %s417_s2, %s286_s25  ;;  %s24_s22 = int_to_ptr.vmem [resolvable:$true] %s23_s22 }
   0x3   :  { %p290_p1 = scmp.lt.u32.totalorder %s286_s25, %s417_s2 }
   0x5   :  { %p292_p2 = pnand %p290_p1, %p287_p0 }
   0x7   :  { %295 = shalt.err (!%p292_p2)
}
   0x8   :  { %s296_s30 = scalar_lea.vmem %s24_s22, 512  ;;  %p301_p4 = scmp.lt.s32.totalorder %s24_s22, %s24_s22 }
   0x9   :  { %p297_p3 = scmp.ne.s32.totalorder %s24_s22, %s296_s30  ;;  %p302_p5 = scmp.lt.s32.totalorder %s296_s30, %s296_s30 }
   0xb   :  { %p303_p6 = por %p302_p5, %p301_p4 }
   0xd   :  { %p304_p7 = pnand %p303_p6, %p297_p3 }
   0xf   :  { %307 = shalt.err (!%p304_p7)
}
  0x10   :  { %s335_s7 = smov 256   ;;  %s336_s8 = smov 16  }
  0x11   :  { %29 = dma.hbm_to_vmem [thread:$0]  %s417_s2, 512, %s24_s22, [#allocation4], %s335_s7, %s335_s7, %s336_s8  }
  0x12   :  { %s337_s11 = smov [#allocation5]   ;;  %s308_s15 = scalar_lea.hbm %s418_s3, 1024 }
  0x13   :  { %s35_s12 = sshll.u32 %s337_s11, 4  ;;  %p309_p8 = scmp.ne.s32.totalorder %s418_s3, %s308_s15  ;;  %s36_s12 = int_to_ptr.vmem [resolvable:$true] %s35_s12 }
  0x14   :  { %p312_p9 = scmp.lt.u32.totalorder %s308_s15, %s418_s3 }
  0x16   :  { %p314_p10 = pnand %p312_p9, %p309_p8 }
  0x18   :  { %317 = shalt.err (!%p314_p10)
}
  0x19   :  { %s318_s20 = scalar_lea.vmem %s36_s12, 1024  ;;  %p323_p12 = scmp.lt.s32.totalorder %s36_s12, %s36_s12 }
  0x1a   :  { %p319_p11 = scmp.ne.s32.totalorder %s36_s12, %s318_s20  ;;  %p324_p13 = scmp.lt.s32.totalorder %s318_s20, %s318_s20 }
  0x1c   :  { %p325_p0 = por %p324_p13, %p323_p12 }
  0x1e   :  { %p326_p1 = pnand %p325_p0, %p319_p11 }
  0x20   :  { %329 = shalt.err (!%p326_p1)
}
  0x21   :  { %41 = dma.hbm_to_vmem [thread:$0]  %s418_s3, 1024, %s36_s12, [#allocation6], %s335_s7, %s335_s7, %s336_s8  }
  0x22   :  { %330 = dma.done.wait [#allocation4], 512  }
  0x23   :  { %331 = vsyncadd [#allocation4], 4294966784 }
  0x24   :  { %332 = dma.done.wait [#allocation6], 1024  }
  0x25   :  { %333 = vsyncadd [#allocation6], 4294966272  ;;  %v338_v0 = vmov 0   ;;  %v53_v1 = vld [vmem:[%s416_s1] sm:$0xff]  ;;  %v73_v2 = vld [vmem:[#allocation5 + $0x8] sm:$0xff]  ;;  %v339_v20 = vmov 1   ;;  %v54_v24 = vlaneseq  ;;  %v250_v47 = vstv %s420_s5 }
  0x26   :  { %284 = vset.pattern.permute.xlu0 %v338_v0  ;;  %v75_v3 = vld [vmem:[#allocation5 + $0x18] sm:$0xff]  ;;  %v72_v5 = vld [vmem:[#allocation5] sm:$0xff]  ;;  %v74_v6 = vld [vmem:[#allocation5 + $0x10] sm:$0xff]  ;;  %v57_v8 = vadd.s32 16, %v53_v1  ;;  %v340_v22 = vmov 0.0   ;;  %vm155_vm0 = vcmask 130048  }
  0x27   :  { %59 = vperm.xlu0 %284, %v53_v1   ;;  %v263_v4 = vpack.c.bf16 %v75_v3, %v73_v2  ;;  %v69_v7 = vld [vmem:[#allocation3 + $0x8] sm:$0xff]  ;;  %v265_v9 = vpack.c.bf16 %v74_v6, %v72_v5  ;;  %v71_v10 = vld [vmem:[#allocation3 + $0x18] sm:$0xff]  ;;  %v68_v15 = vld [vmem:[#allocation3] sm:$0xff]  ;;  %223 = vmatprep.mubr.f32.mxu0 %v340_v22  ;;  %v55_v25 = vand.u32 127, %v54_v24  ;;  %vm80_vm2 = vcmask 261120  }
  0x28   :  { %v77_v11 = vld [vmem:[#allocation5 + $0x28] sm:$0xff]  ;;  %v79_v12 = vld [vmem:[#allocation5 + $0x38] sm:$0xff]  ;;  %v271_v13 = vpack.c.bf16 %v71_v10, %v69_v7  ;;  %v70_v16 = vld [vmem:[#allocation3 + $0x10] sm:$0xff]  ;;  %148 = vmatprep.mubr.f32.mxu1 %v340_v22  ;;  %v235_v32 = vshrl.u32 %v54_v24, 7  ;;  %vm252_vm4 = vcmask 7168  }
  0x29   :  { %264 = vmatprep.subr.bf16.mxu1 %v263_v4  ;;  %v267_v14 = vpack.c.bf16 %v79_v12, %v77_v11  ;;  %v76_v17 = vld [vmem:[#allocation5 + $0x20] sm:$0xff]  ;;  %v273_v18 = vpack.c.bf16 %v70_v16, %v68_v15  ;;  %v78_v19 = vld [vmem:[#allocation5 + $0x30] sm:$0xff]  ;;  %vm56_vm1 = vcmp.lt.s32.totalorder %v55_v25, 16 }
  0x2a   :  { %266 = vmatpush1.bf16.msra.mxu1 %v265_v9  ;;  %272 = vmatprep.subr.bf16.mxu0 %v271_v13  ;;  %v269_v21 = vpack.c.bf16 %v78_v19, %v76_v17  ;;  %v52_v23 = vld [vmem:[%s415_s0] sm:$0xff]  ;;  %v236_v33 = vsub.s32 0, %v235_v32  ;;  %v240_v35 = vsub.s32 1, %v235_v32 }
  0x2b   :  { %285 = vset.pattern.permute.xlu0 %v339_v20  ;;  %268 = vmatprep.subr.bf16.mxu1 %v267_v14  ;;  %v232_v34 = vld [vmem:[%s419_s4] sm:$0x3] }
  0x2c   :  { %62 = vperm.xlu0 %285, %v57_v8   ;;  %274 = vmatpush1.bf16.msra.mxu0 %v273_v18  ;;  %v237_v39 = vrot.slane %v232_v34, %v236_v33  ;;  %v241_v41 = vrot.slane %v232_v34, %v240_v35 }
  0x2e   :  { %270 = vmatpush1.bf16.msra.mxu1 %v269_v21 }
  0x2f   :  { %262 = vmatmul.mubr.msk.f32.vlgmr.msra.gmra.mrb[0].mxu0 %vm155_vm0, %v52_v23 }
  0xa6   :  { %v60_v26 = vpop.permute.xlu0 %59 }
  0xab   :  { %v63_v27 = vpop.permute.xlu0 %62 }
  0xac   :  { %v64_v28 = vsel %vm56_vm1, %v60_v26, %v63_v27 }
  0xad   :  { %vm65_vm3 = vcmp.eq.s32.totalorder %v55_v25, %v64_v28 }
  0xae   :  { %v260_v29 = vsel %vm65_vm3, 1.0, %v340_v22 }
  0xaf   :  { %261 = vmatmul.mubr.msk.f32.vlgmr.msra.gmra.mrb[0].mxu1 %vm80_vm2, %v260_v29 }
 0x102   :  { %v225_v30 = vpop.f32.mrb[0].mxu0 }
 0x103   :  { %v227_v31 = vpop.f32.mrb[1].mxu0 }
 0x182   :  { %v150_v36 = vpop.f32.mrb[0].mxu1 }
 0x183   :  { %v226_v37 = vadd.f32 %v225_v30, %v150_v36  ;;  %v152_v38 = vpop.f32.mrb[1].mxu1 }
 0x184   :  { %v228_v40 = vadd.f32 %v227_v31, %v152_v38 }
 0x185   :  { %v230_v42 = vmax.f32 %v226_v37, 0.0 }
 0x186   :  { %v231_v43 = vmax.f32 %v228_v40, 0.0 }
 0x187   :  { %v244_v44 = vmul.f32 %v237_v39, %v230_v42 }
 0x188   :  { %v245_v45 = vmul.f32 %v241_v41, %v231_v43 }
 0x18a   :  { %v246_v46 = vadd.f32 %v245_v45, %v244_v44 }
 0x18c   :  { %247 = vadd.xlane.f32.xlu1 %v246_v46 }
 0x219   :  { %v248_v48 = vpop.xlane.xlu1 %247 }
 0x21a   :  { %v251_v49 = vadd.f32 %v250_v47, %v248_v48 }
 0x21c   :  { %253 = vst.msk [vmem:[%s421_s6] sm:$0xff] %vm252_vm4, %v251_v49 }
 0x21d   :  { %258 = vsyncpa [#allocation4], 1 }
 0x21e   :  { %259 = vsyncpa [#allocation6], 1 }

</bundles_post_ra>
